<compile_context>
chip_gen: v7x
topology: tpu7x:2x2x1
jax: 0.10.0
libtpu: 0.0.40
codegen_flags: <defaults>
</compile_context>

<pallas_src>
import functools

import jax
import jax.numpy as jnp
import numpy as np
from jax.experimental import pallas as pl
from jax.experimental.pallas import tpu as pltpu

_VPU_K_THRESHOLD = 8                   # contraction dims <= this -> VPU broadcast-FMAs, not MXU
_BF16_MIN_K = 256                      # contraction dims >= this -> bf16 MXU operands
_VMEM_LIMIT_BYTES = 32 * 1024 * 1024   # safe on v5e/v6e/v7x scoped VMEM
_TILE_VMEM_BUDGET = 8 * 1024 * 1024    # budget for double-buffered x/out tiles
_MAX_TILE_ROWS = 1024


def _round_up(x, m):
    return ((x + m - 1) // m) * m


def _choose_tile_rows(batch, in_dim, out_dim, bytes_per_elem=4):
    """Largest batch tile whose double-buffered x/out tiles fit the VMEM budget."""
    in_pad = _round_up(max(in_dim, 1), 128)
    out_pad = _round_up(max(out_dim, 1), 128)
    per_row = 2 * (in_pad + out_pad) * bytes_per_elem  # 2 = double buffering
    tm = (_TILE_VMEM_BUDGET // per_row) // 8 * 8
    tm = max(8, min(_MAX_TILE_ROWS, tm))
    return min(tm, _round_up(batch, 8))


def mlp_kernel(x_ref, w1_ref, b1_ref, w2_ref, b2_ref, w3_ref, b3_ref, o_ref):
    x = x_ref[...]
    k = x.shape[1]

    # ---- fc1 + ReLU ----
    if k <= _VPU_K_THRESHOLD:
        # Tiny contraction dim: VPU broadcast-FMAs in f32 (don't waste an MXU push/pop).
        w1 = w1_ref[...].astype(jnp.float32)
        xf = x.astype(jnp.float32)
        acc = xf[:, 0:1] * w1[0:1, :]
        for i in range(1, k):           # k is static (trace-time unroll)
            acc = acc + xf[:, i:i + 1] * w1[i:i + 1, :]
        h1 = acc + b1_ref[...]
    else:
        h1 = jnp.dot(x, w1_ref[...], preferred_element_type=jnp.float32) + b1_ref[...]
    h1 = jnp.maximum(h1, 0.0)

    # ---- fc2 + ReLU (MXU, f32 accumulate) ----
    h2 = jnp.dot(h1.astype(w2_ref.dtype), w2_ref[...],
                 preferred_element_type=jnp.float32) + b2_ref[...]
    h2 = jnp.maximum(h2, 0.0)

    # ---- fc3 (no activation) ----
    o_ref[...] = (jnp.dot(h2.astype(w3_ref.dtype), w3_ref[...],
                          preferred_element_type=jnp.float32)
                  + b3_ref[...]).astype(o_ref.dtype)


def prepare_params(params, mxu_dtype=jnp.bfloat16):
    """Hoist layout/dtype work out of the per-call path.

    PyTorch-style params (w: [out, in], b: [out]) -> kernel layout:
      w: [in, out] (so the kernel does x @ W), b: [1, out] f32.
    MXU-facing weights are cast to `mxu_dtype` only when the contraction dim is large enough
    for bf16 throughput to matter; small layers stay f32 (same speed at tiny K, exact math).
    """
    def layer_dtype(k):
        if k <= _VPU_K_THRESHOLD:
            return jnp.float32          # runs on the VPU
        return mxu_dtype if k >= _BF16_MIN_K else jnp.float32

    w1t = jnp.asarray(params["w1"]).T
    w2t = jnp.asarray(params["w2"]).T
    w3t = jnp.asarray(params["w3"]).T
    return dict(
        w1=w1t.astype(layer_dtype(w1t.shape[0])),
        w2=w2t.astype(layer_dtype(w2t.shape[0])),
        w3=w3t.astype(layer_dtype(w3t.shape[0])),
        b1=jnp.asarray(params["b1"], jnp.float32).reshape(1, -1),
        b2=jnp.asarray(params["b2"], jnp.float32).reshape(1, -1),
        b3=jnp.asarray(params["b3"], jnp.float32).reshape(1, -1),
    )


@functools.partial(jax.jit, static_argnames=("tile_rows",))
def generic_network_forward(x, kparams, *, tile_rows=None):
    """x: [B, input_dims] float32. kparams: output of prepare_params()."""
    w1, b1 = kparams["w1"], kparams["b1"]
    w2, b2 = kparams["w2"], kparams["b2"]
    w3, b3 = kparams["w3"], kparams["b3"]

    B, in_dim = x.shape
    n_actions = w3.shape[1]

    vpu_first = in_dim <= _VPU_K_THRESHOLD
    x_in = x.astype(jnp.float32 if vpu_first else w1.dtype)

    tm = tile_rows if tile_rows is not None else _choose_tile_rows(B, in_dim, n_actions)
    tm = max(8, min(_round_up(tm, 8), _round_up(B, 8)))
    grid = (pl.cdiv(B, tm),)

    def resident(a):  # whole array, same block every grid step -> stays VMEM-resident
        return pl.BlockSpec(a.shape, lambda i: (0,) * a.ndim)

    return pl.pallas_call(
        mlp_kernel,
        out_shape=jax.ShapeDtypeStruct((B, n_actions), jnp.float32),
        grid=grid,
        in_specs=[
            pl.BlockSpec((tm, in_dim), lambda i: (i, 0)),   # batch-tiled activations
            resident(w1), resident(b1),
            resident(w2), resident(b2),
            resident(w3), resident(b3),
        ],
        out_specs=pl.BlockSpec((tm, n_actions), lambda i: (i, 0)),
        compiler_params=pltpu.CompilerParams(
            dimension_semantics=("parallel",),   # v7x: shard batch tiles across 2 TCs
            vmem_limit_bytes=_VMEM_LIMIT_BYTES,
        ),
    )(x_in, w1, b1, w2, b2, w3, b3)


def init_params(key, input_dims, fc1_dims, fc2_dims, n_actions):
    """Deterministic init mimicking nn.Linear default (uniform(-1/sqrt(fan_in), 1/sqrt(fan_in)))."""
    ks = jax.random.split(key, 6)

    def lin(kw, kb, fan_in, fan_out):
        bound = 1.0 / np.sqrt(fan_in)
        w = jax.random.uniform(kw, (fan_out, fan_in), jnp.float32, -bound, bound)
        b = jax.random.uniform(kb, (fan_out,), jnp.float32, -bound, bound)
        return w, b

    w1, b1 = lin(ks[0], ks[1], input_dims, fc1_dims)
    w2, b2 = lin(ks[2], ks[3], fc1_dims, fc2_dims)
    w3, b3 = lin(ks[4], ks[5], fc2_dims, n_actions)
    return dict(w1=w1, b1=b1, w2=w2, b2=b2, w3=w3, b3=b3)


def reference_forward(x, p):
    h1 = jnp.maximum(x @ p["w1"].T + p["b1"], 0.0)
    h2 = jnp.maximum(h1 @ p["w2"].T + p["b2"], 0.0)
    return h2 @ p["w3"].T + p["b3"]


if __name__ == "__main__":
    key = jax.random.PRNGKey(0)
    k_param, k_x = jax.random.split(key)

    # MountainCarContinuous-style: observation dim 2, two network outputs.
    # batch=40 with tile_rows=16 exercises a multi-step grid incl. a ragged last tile.
    batch = 40
    input_dims, fc1_dims, fc2_dims, n_actions = 2, 32, 32, 2

    params = init_params(k_param, input_dims, fc1_dims, fc2_dims, n_actions)
    kparams = prepare_params(params)  # one-time transpose/reshape/cast (hoisted)
    x = jax.random.normal(k_x, (batch, input_dims), dtype=jnp.float32)

    out = generic_network_forward(x, kparams, tile_rows=16)
    out = jax.block_until_ready(out)

    ref = reference_forward(x, params)  # f32 reference (PyTorch semantics)
    # At these hidden dims all operands stay f32 (bf16 only kicks in for K >= 256),
    # so the kernel should match the f32 reference tightly.
    np.testing.assert_allclose(np.asarray(out), np.asarray(ref), rtol=1e-4, atol=1e-4)

    # Default tiling path (single grid step for this batch) also exercised once.
    out2 = jax.block_until_ready(generic_network_forward(x, kparams))
    np.testing.assert_allclose(np.asarray(out2), np.asarray(ref), rtol=1e-4, atol=1e-4)

    # TODO(synk): Adam optimizer / device placement from the PyTorch module are training
    # plumbing, not part of the forward pass, and are intentionally not implemented.
    print("KERNEL_OK")
</pallas_src>

<mosaic_0001>
module attributes {stable_mosaic.version = 11 : i64} {
  func.func @mlp_kernel(%arg0: i32, %arg1: memref<16x2xf32, #tpu.memory_space<vmem>>, %arg2: memref<2x32xf32, #tpu.memory_space<vmem>>, %arg3: memref<1x32xf32, #tpu.memory_space<vmem>>, %arg4: memref<32x32xf32, #tpu.memory_space<vmem>>, %arg5: memref<1x32xf32, #tpu.memory_space<vmem>>, %arg6: memref<32x2xf32, #tpu.memory_space<vmem>>, %arg7: memref<1x2xf32, #tpu.memory_space<vmem>>, %arg8: memref<16x2xf32, #tpu.memory_space<vmem>>) attributes {dimension_semantics = [#tpu.dimension_semantics<parallel>], iteration_bounds = array<i64: 3>, scalar_prefetch = 0 : i64, scratch_operands = 0 : i64, tpu.core_type = #tpu.core_type<tc>, window_params = [{transform_indices = @transform_0, window_bounds = array<i64: 16, 2>}, {pipeline_mode = #tpu.pipeline_mode<synchronous>, transform_indices = @transform_1, window_bounds = array<i64: 2, 32>}, {pipeline_mode = #tpu.pipeline_mode<synchronous>, transform_indices = @transform_2, window_bounds = array<i64: 1, 32>}, {pipeline_mode = #tpu.pipeline_mode<synchronous>, transform_indices = @transform_3, window_bounds = array<i64: 32, 32>}, {pipeline_mode = #tpu.pipeline_mode<synchronous>, transform_indices = @transform_4, window_bounds = array<i64: 1, 32>}, {pipeline_mode = #tpu.pipeline_mode<synchronous>, transform_indices = @transform_5, window_bounds = array<i64: 32, 2>}, {pipeline_mode = #tpu.pipeline_mode<synchronous>, transform_indices = @transform_6, window_bounds = array<i64: 1, 2>}, {transform_indices = @transform_7, window_bounds = array<i64: 16, 2>}]} {
    %c0 = arith.constant 0 : index
    %c0_0 = arith.constant 0 : index
    %0 = vector.load %arg1[%c0, %c0_0] : memref<16x2xf32, #tpu.memory_space<vmem>>, vector<16x2xf32>
    %c0_1 = arith.constant 0 : index
    %c0_2 = arith.constant 0 : index
    %1 = vector.load %arg2[%c0_1, %c0_2] : memref<2x32xf32, #tpu.memory_space<vmem>>, vector<2x32xf32>
    %2 = vector.extract_strided_slice %0 {offsets = [0, 0], sizes = [16, 1], strides = [1, 1]} : vector<16x2xf32> to vector<16x1xf32>
    %3 = vector.extract_strided_slice %1 {offsets = [0, 0], sizes = [1, 32], strides = [1, 1]} : vector<2x32xf32> to vector<1x32xf32>
    %4 = vector.broadcast %2 : vector<16x1xf32> to vector<16x32xf32>
    %5 = vector.broadcast %3 : vector<1x32xf32> to vector<16x32xf32>
    %6 = arith.mulf %4, %5 : vector<16x32xf32>
    %7 = vector.extract_strided_slice %0 {offsets = [0, 1], sizes = [16, 1], strides = [1, 1]} : vector<16x2xf32> to vector<16x1xf32>
    %8 = vector.extract_strided_slice %1 {offsets = [1, 0], sizes = [1, 32], strides = [1, 1]} : vector<2x32xf32> to vector<1x32xf32>
    %9 = vector.broadcast %7 : vector<16x1xf32> to vector<16x32xf32>
    %10 = vector.broadcast %8 : vector<1x32xf32> to vector<16x32xf32>
    %11 = arith.mulf %9, %10 : vector<16x32xf32>
    %12 = arith.addf %6, %11 : vector<16x32xf32>
    %c0_3 = arith.constant 0 : index
    %c0_4 = arith.constant 0 : index
    %13 = vector.load %arg3[%c0_3, %c0_4] : memref<1x32xf32, #tpu.memory_space<vmem>>, vector<1x32xf32>
    %14 = vector.broadcast %13 : vector<1x32xf32> to vector<16x32xf32>
    %15 = arith.addf %12, %14 : vector<16x32xf32>
    %cst = arith.constant 0.000000e+00 : f32
    %16 = vector.broadcast %cst : f32 to vector<16x32xf32>
    %17 = arith.maximumf %15, %16 : vector<16x32xf32>
    %c0_5 = arith.constant 0 : index
    %c0_6 = arith.constant 0 : index
    %18 = vector.load %arg4[%c0_5, %c0_6] : memref<32x32xf32, #tpu.memory_space<vmem>>, vector<32x32xf32>
    %cst_7 = arith.constant dense<0.000000e+00> : vector<16x32xf32>
    %19 = tpu.matmul %17, %18, %cst_7 {dimension_numbers = #tpu.dot_dimension_numbers<[1], [0], [0], [1], [0, 0, 1, 1], [], []>} : vector<16x32xf32>, vector<32x32xf32>, vector<16x32xf32> -> vector<16x32xf32>
    %c0_8 = arith.constant 0 : index
    %c0_9 = arith.constant 0 : index
    %20 = vector.load %arg5[%c0_8, %c0_9] : memref<1x32xf32, #tpu.memory_space<vmem>>, vector<1x32xf32>
    %21 = vector.broadcast %20 : vector<1x32xf32> to vector<16x32xf32>
    %22 = arith.addf %19, %21 : vector<16x32xf32>
    %cst_10 = arith.constant 0.000000e+00 : f32
    %23 = vector.broadcast %cst_10 : f32 to vector<16x32xf32>
    %24 = arith.maximumf %22, %23 : vector<16x32xf32>
    %c0_11 = arith.constant 0 : index
    %c0_12 = arith.constant 0 : index
    %25 = vector.load %arg6[%c0_11, %c0_12] : memref<32x2xf32, #tpu.memory_space<vmem>>, vector<32x2xf32>
    %cst_13 = arith.constant dense<0.000000e+00> : vector<16x2xf32>
    %26 = tpu.matmul %24, %25, %cst_13 {dimension_numbers = #tpu.dot_dimension_numbers<[1], [0], [0], [1], [0, 0, 1, 1], [], []>} : vector<16x32xf32>, vector<32x2xf32>, vector<16x2xf32> -> vector<16x2xf32>
    %c0_14 = arith.constant 0 : index
    %c0_15 = arith.constant 0 : index
    %27 = vector.load %arg7[%c0_14, %c0_15] : memref<1x2xf32, #tpu.memory_space<vmem>>, vector<1x2xf32>
    %28 = vector.broadcast %27 : vector<1x2xf32> to vector<16x2xf32>
    %29 = arith.addf %26, %28 : vector<16x2xf32>
    %c0_16 = arith.constant 0 : index
    %c0_17 = arith.constant 0 : index
    %30 = vector.load %arg8[%c0_16, %c0_17] : memref<16x2xf32, #tpu.memory_space<vmem>>, vector<16x2xf32>
    tpu.vector_store %arg8[%c0_16, %c0_17], %29 {strides = array<i32>} : memref<16x2xf32, #tpu.memory_space<vmem>>, vector<16x2xf32>,
    return
  }
  func.func @transform_0(%arg0: i32) -> (i32, i32) {
    %c0_i32 = arith.constant 0 : i32
    %c0_i32_0 = arith.constant 0 : i32
    return %arg0, %c0_i32 : i32, i32
  }
  func.func @transform_1(%arg0: i32) -> (i32, i32) {
    %c0_i32 = arith.constant 0 : i32
    %c0_i32_0 = arith.constant 0 : i32
    %c0_i32_1 = arith.constant 0 : i32
    return %c0_i32, %c0_i32_0 : i32, i32
  }
  func.func @transform_2(%arg0: i32) -> (i32, i32) {
    %c0_i32 = arith.constant 0 : i32
    %c0_i32_0 = arith.constant 0 : i32
    %c0_i32_1 = arith.constant 0 : i32
    return %c0_i32, %c0_i32_0 : i32, i32
  }
  func.func @transform_3(%arg0: i32) -> (i32, i32) {
    %c0_i32 = arith.constant 0 : i32
    %c0_i32_0 = arith.constant 0 : i32
    %c0_i32_1 = arith.constant 0 : i32
    return %c0_i32, %c0_i32_0 : i32, i32
  }
  func.func @transform_4(%arg0: i32) -> (i32, i32) {
    %c0_i32 = arith.constant 0 : i32
    %c0_i32_0 = arith.constant 0 : i32
    %c0_i32_1 = arith.constant 0 : i32
    return %c0_i32, %c0_i32_0 : i32, i32
  }
  func.func @transform_5(%arg0: i32) -> (i32, i32) {
    %c0_i32 = arith.constant 0 : i32
    %c0_i32_0 = arith.constant 0 : i32
    %c0_i32_1 = arith.constant 0 : i32
    return %c0_i32, %c0_i32_0 : i32, i32
  }
  func.func @transform_6(%arg0: i32) -> (i32, i32) {
    %c0_i32 = arith.constant 0 : i32
    %c0_i32_0 = arith.constant 0 : i32
    %c0_i32_1 = arith.constant 0 : i32
    return %c0_i32, %c0_i32_0 : i32, i32
  }
  func.func @transform_7(%arg0: i32) -> (i32, i32) {
    %c0_i32 = arith.constant 0 : i32
    %c0_i32_0 = arith.constant 0 : i32
    return %arg0, %c0_i32 : i32, i32
  }
}

</mosaic_0001>

<bundles_post_ra>
// kernel: generic_network_forward.1
= control target key start
LH: loop header
LB: loop body
LE: loop exit
PB: predicated region body
PF: predicated region fallthrough
CT: control target
= control target key end

     0   :  { %s1063_s24 = smov 0   ;;  %s1065_s25 = smov 0   ;;  %s1186_s0 = inlined_call_operand.vmem [shape: f32[40,2], index: 0, kind: input, shape index: {}]   ;;  %s1187_s1 = inlined_call_operand.vmem [shape: f32[2,32], index: 1, kind: input, shape index: {}]   ;;  %s1188_s2 = inlined_call_operand.vmem [shape: f32[1,32], index: 2, kind: input, shape index: {}]   ;;  %s1189_s3 = inlined_call_operand.vmem [shape: f32[32,32], index: 3, kind: input, shape index: {}]   ;;  %s1190_s4 = inlined_call_operand.vmem [shape: f32[1,32], index: 4, kind: input, shape index: {}]   ;;  %s1191_s5 = inlined_call_operand.vmem [shape: f32[32,2], index: 5, kind: input, shape index: {}]   ;;  %s1192_s6 = inlined_call_operand.vmem [shape: f32[1,2], index: 6, kind: input, shape index: {}]   ;;  %s1193_s7 = inlined_call_operand.vmem [shape: f32[40,2], index: 7, kind: output, shape index: {}]  }
   0x1   :  { %s1067_s26 = smov 0  }
   0x2 LB: > { %s1076_s27 = sadd.s32 4294967295, %s987_s26   ;;  %s1078_s28 = sadd.s32 1, %s987_s26   ;;  %s987_s26 = sphi %s1067_s26, %s1197_s26   ;;  %s983_s25 = sphi %s1065_s25, %s1196_s25   ;;  %s979_s24 = sphi %s1063_s24, %s1195_s24  }
   0x3   : > { %s173_s29 = ssub.s32 %s987_s26, %s1078_s28  ;;  %s176_s30 = sadd.s32 1, %s983_s25 }
   0x4   : > { %p174_p0 = scmp.eq.s32.totalorder %s173_s29, 0  ;;  %p186_p1 = scmp.ne.s32.totalorder %s983_s25, %s979_s24 }
   0x5   : > { %p187_p2 = scmp.eq.s32.totalorder %s1076_s27, 2  ;;  %p758_p3 = scmp.ge.s32.totalorder %s987_s26, 1 }
   0x6   : > { %s1086_s8 = scalar_select %p174_p0, %s983_s25, %s176_s30  }
   0x7   : > { %p1088_p4 = por %p187_p2, %p186_p1  ;;  %p246_p5 = scmp.lt.s32.totalorder %s987_s26, 4 }
   0x9   : > { %p247_p6 = pnand %p758_p3, %p246_p5 }
   0xa   : > { %s1093_s10 = sshll.u32 (!%p247_p6), %s1076_s27, 1  ;;  %v1021_v0 = vmov (!%p247_p6), 0   ;;  %v346_v3 = vld [vmem:[%s1189_s3] sm:$0xff] (!%p247_p6)  ;;  %v347_v4 = vld [vmem:[%s1189_s3 + $0x8] sm:$0xff] (!%p247_p6)  ;;  %v1022_v5 = vmov (!%p247_p6), 1   ;;  %v348_v7 = vld [vmem:[%s1189_s3 + $0x10] sm:$0xff] (!%p247_p6)  ;;  %v313_v13 = vlaneseq (!%p247_p6) }
   0xb   : > { %250 = sbr.rel (%p247_p6) target bundleno = 648 (0x288), region = 48  ;;  %931 = vset.pattern.permute.xlu1 (!%p247_p6), %v1021_v0  ;;  %929 = vset.pattern.permute.xlu0 (!%p247_p6), %v1021_v0  ;;  %p286_p7 = scmp.lt.s32.totalorder (!%p247_p6), %s1093_s10, 4  ;;  %v823_v6 = vpack.c.bf16 (!%p247_p6), %v347_v4, %v346_v3  ;;  %v349_v8 = vld [vmem:[%s1189_s3 + $0x18] sm:$0xff] (!%p247_p6)  ;;  %v441_v10 = vld [vmem:[%s1191_s5] sm:$0xff] (!%p247_p6)  ;;  %v442_v11 = vld [vmem:[%s1191_s5 + $0x8] sm:$0xff] (!%p247_p6)  ;;  %vm357_vm0 = vcmask (!%p247_p6), 261120  }
   0xc   : > { %v827_v9 = vpack.c.bf16 (!%p247_p6), %v349_v8, %v348_v7  ;;  %v831_v12 = vpack.c.bf16 (!%p247_p6), %v442_v11, %v441_v10  ;;  %v314_v14 = vshrl.u32 (!%p247_p6), %v313_v13, 7  ;;  %v302_v17 = vld [vmem:[%s1187_s1] sm:$0x3] (!%p247_p6)  ;;  %v443_v35 = vld [vmem:[%s1191_s5 + $0x10] sm:$0xff] (!%p247_p6)  ;;  %v444_v36 = vld [vmem:[%s1191_s5 + $0x18] sm:$0xff] (!%p247_p6)  ;;  %s278_s22 = sand.u32 (!%p247_p6), 1, %s979_s24  }
   0xd   : > { %824 = vmatprep.subr.bf16.mxu0 (!%p247_p6), %v823_v6  ;;  %v762_v28 = vld [vmem:[%s1188_s2] ss:$0 sm:$0xff] (!%p247_p6)  ;;  %v835_v37 = vpack.c.bf16 (!%p247_p6), %v444_v36, %v443_v35  ;;  %s759_s23 = sshll.u32 (!%p247_p6), %s278_s22, 4  ;;  %vm533_vm1 = vcmask (!%p247_p6), 15360  }
   0xe   : > { %826 = vmatpush3.bf16.msra.mxu0 (!%p247_p6), %v823_v6  ;;  %832 = vmatprep.subr.bf16.mxu1 (!%p247_p6), %v831_v12  ;;  %v315_v15 = vsub.s32 (!%p247_p6), 0, %v314_v14  ;;  %v329_v16 = vsub.s32 (!%p247_p6), 1, %v314_v14  ;;  %v763_v38 = vld [vmem:[%s1190_s4] ss:$0 sm:$0xff] (!%p247_p6)  ;;  %s1141_s30 = scalar_lea.vmem (!%p247_p6), [#allocation2], %s759_s23  }
   0xf   : > { %828 = vmatprep.subr.bf16.mxu0 (!%p247_p6), %v827_v9  ;;  %834 = vmatpush3.bf16.msra.mxu1 (!%p247_p6), %v831_v12  ;;  %v766_v45 = vld [vmem:[%s1192_s6] ss:$0 sm:$0xff] (!%p247_p6) }
  0x10   : > { %v316_v20 = vrot.slane (!%p247_p6), %v302_v17, %v315_v15  ;;  %v330_v21 = vrot.slane (!%p247_p6), %v302_v17, %v329_v16  ;;  %836 = vmatprep.subr.bf16.mxu1 (!%p247_p6), %v835_v37 }
  0x12   : > { %s287_s11 = scalar_select %p286_p7, %s1093_s10, 4  ;;  %830 = vmatpush3.bf16.msra.mxu0 %v827_v9 }
  0x13   : > { %838 = vmatpush3.bf16.msra.mxu1 %v835_v37  ;;  %s544_s24 = ssub.s32 (%p1088_p4), 5, %s1093_s10 }
  0x14   : > { %s761_s12 = sshll.u32 %s287_s11, 3  ;;  %s786_s11 = sshll.u32 (%p1088_p4), %s1076_s27, 4 }
  0x15   : > { %s289_s15 = scalar_lea.vmem %s1186_s0, %s761_s12  ;;  %p545_p8 = scmp.lt.s32.totalorder (%p1088_p4), %s544_s24, 2 }
  0x16   : > { %v301_v1 = vld [vmem:[%s289_s15 + $0x8] sm:$0xff]  ;;  %v300_v2 = vld [vmem:[%s289_s15] sm:$0xff]  ;;  %s1152_s14 = scalar_lea.vmem (%p1088_p4), %s1193_s7, %s786_s11  }
  0x17   : > { %310 = vperm.xlu1 %931, %v301_v1   ;;  %305 = vperm.xlu0 %929, %v300_v2  }
  0x1b   : > { %932 = vset.pattern.permute.xlu1 %v1022_v5  ;;  %930 = vset.pattern.permute.xlu0 %v1022_v5 }
  0x1c   : > { %324 = vperm.xlu1 %932, %v301_v1   ;;  %320 = vperm.xlu0 %930, %v300_v2  }
  0x96   : > { %v306_v18 = vpop.permute.xlu0 %305  ;;  %v311_v19 = vpop.permute.xlu1 %310 }
  0x97   : > { %v317_v24 = vmul.f32 %v316_v20, %v306_v18  ;;  %v318_v25 = vmul.f32 %v316_v20, %v311_v19 }
  0x9b   : > { %v325_v22 = vpop.permute.xlu1 %324  ;;  %v321_v23 = vpop.permute.xlu0 %320 }
  0x9c   : > { %v332_v26 = vmul.f32 %v330_v21, %v325_v22  ;;  %v331_v27 = vmul.f32 %v330_v21, %v321_v23 }
  0x9e   : > { %v334_v29 = vadd.f32 %v332_v26, %v318_v25  ;;  %v333_v30 = vadd.f32 %v331_v27, %v317_v24 }
  0xa0   : > { %v342_v31 = vadd.f32 %v762_v28, %v333_v30  ;;  %v343_v32 = vadd.f32 %v762_v28, %v334_v29 }
  0xa2   : > { %v344_v33 = vmax.f32 %v342_v31, 0.0  ;;  %v345_v34 = vmax.f32 %v343_v32, 0.0 }
  0xa4   : > { %809 = vmatprep.mubr.msk.f32.mxu0 %vm357_vm0, %v344_v33 }
  0xa5   : > { %810 = vmatmul.mubr.msk.f32.vlgmr.msra.gmra.mrb[0].mxu0 %vm357_vm0, %v345_v34 }
 0x178   : > { %v811_v39 = vpop.f32.mrb[0].mxu0 }
 0x179   : > { %v436_v40 = vadd.f32 %v811_v39, %v763_v38  ;;  %v430_v41 = vpop.f32.mrb[1].mxu0 }
 0x17a   : > { %v431_v42 = vadd.f32 %v763_v38, %v430_v41 }
 0x17b   : > { %v440_v44 = vmax.f32 %v436_v40, 0.0 }
 0x17c   : > { %v439_v43 = vmax.f32 %v431_v42, 0.0 }
 0x17e   : > { %820 = vmatprep.mubr.msk.f32.mxu1 %vm357_vm0, %v439_v43 }
 0x17f   : > { %821 = vmatmul.mubr.msk.f32.vlgmr.msra.gmra.mrb[0].mxu1 %vm357_vm0, %v440_v44 }
 0x250   : > { %542 = sbr.rel (!%p1088_p4) target bundleno = 648 (0x288), region = 52 }
 0x252   : > { %v822_v46 = vpop.f32.mrb[0].mxu1 }
 0x253   : > { %v530_v47 = vadd.f32 %v822_v46, %v766_v45  ;;  %v524_v48 = vpop.f32.mrb[1].mxu1 }
 0x254   : > { %v525_v49 = vadd.f32 %v766_v45, %v524_v48 }
 0x255   : > { %535 = vst.msk [vmem:[%s1141_s30 + $0x8] sm:$0xff] %vm533_vm1, %v530_v47 }
 0x256   : > { %534 = vst.msk [vmem:[%s1141_s30] sm:$0xff] %vm533_vm1, %v525_v49 }
 0x257   : > { %s1199_s24 = smov (!%p545_p8, %s544_s24), 2 }
 0x258   : > { %s771_s15 = sshll.u32 %s1199_s24, 7 }
 0x259   : > { %p774_p9 = scmp.eq.s32.totalorder %s771_s15, 0 }
 0x25a   : > { %s1158_s16 = sshrl.u32 (!%p774_p9), %s1199_s24, 1 }
 0x25b   : > { %553 = sbr.rel (%p774_p9) target bundleno = 648 (0x288), region = 56  ;;  %p775_p10 = scmp.le.s32.totalorder (!%p774_p9), %s1158_s16, 0 }
 0x262   : > { %711 = sbr.rel (%p775_p10) target bundleno = 627 (0x273), region = 132  ;;  %s989_s27 = smov (!%p775_p10), %s1152_s14  }
 0x263   : > { %s993_s9 = smov (!%p775_p10), %s1141_s30   ;;  %s997_s10 = smov (!%p775_p10), 0  }
 0x264   : > { %s1001_s17 = smov (!%p775_p10), 0  }
 0x269 LB: >> { %v617_v50 = vld [vmem:[%s995_s9] sm:$0xff]  ;;  %v619_v51 = vld [vmem:[%s995_s9 + $0x8] sm:$0xff]  ;;  %s621_s18 = sadd.s32 1, %s999_s10  ;;  %s611_s17 = sadd.s32 1, %s1003_s17   ;;  %s1003_s17 = sphi %s1001_s17, %s611_s17   ;;  %s999_s10 = sphi %s997_s10, %s998_s10   ;;  %s995_s9 = sphi %s993_s9, %s626_s9   ;;  %s991_s27 = sphi %s989_s27, %s627_s27  }
 0x26a   : >> { %618 = vst [vmem:[%s991_s27] sm:$0xff] %v617_v50  ;;  %620 = vst [vmem:[%s991_s27 + $0x8] sm:$0xff] %v619_v51  ;;  %p622_p11 = scmp.ge.s32.totalorder %s621_s18, %s1158_s16  ;;  %p610_p12 = scmp.ge.s32.totalorder %s611_s17, %s1158_s16 }
 0x26c   : >> { %s1201_s18 = smov (%p622_p11, %s621_s18), 0  ;;  %613 = sbr.rel (!%p610_p12) target bundleno = 617 (0x269), region = 138 }
 0x26d   : >> { %s776_s19 = sshll.u32 %s1201_s18, 4  ;;  %s998_s10 = smov %s1201_s18  }
 0x26e   : >> { %s626_s9 = scalar_lea.vmem %s1141_s30, %s776_s19 [#allocation2]   ;;  %s627_s27 = scalar_lea.vmem %s1152_s14, %s776_s19  }
 0x273 PF: > { %s1168_s20 = sand.u32 1, %s1199_s24   ;;  %s787_s21 = sshll.u32 %s1158_s16, 4 }
 0x274   : > { %s632_s22 = scalar_lea.vmem %s1141_s30, %s787_s21 [#allocation2]   ;;  %s634_s23 = scalar_lea.vmem %s1152_s14, %s787_s21  }
 0x275   : > { %p781_p13 = scmp.le.s32.totalorder %s1168_s20, 0 }
 0x276   : > { %s1005_s26 = smov (!%p781_p13), %s634_s23   ;;  %s1009_s29 = smov (!%p781_p13), %s632_s22  }
 0x277   : > { %725 = sbr.rel (%p781_p13) target bundleno = 648 (0x288), region = 143  ;;  %s1013_s11 = smov (!%p781_p13), 0  }
 0x278   : > { %s1017_s12 = smov (!%p781_p13), 0  }
 0x27e LB: >> { %v644_v52 = vld [vmem:[%s1011_s29] sm:$0xff]  ;;  %s646_s24 = sadd.s32 1, %s1015_s11  ;;  %s638_s12 = sadd.s32 1, %s1019_s12   ;;  %s1019_s12 = sphi %s1017_s12, %s638_s12   ;;  %s1015_s11 = sphi %s1013_s11, %s1014_s11   ;;  %s1011_s29 = sphi %s1009_s29, %s651_s29   ;;  %s1007_s26 = sphi %s1005_s26, %s652_s26  }
 0x27f   : >> { %645 = vst [vmem:[%s1007_s26] sm:$0xff] %v644_v52  ;;  %p647_p0 = scmp.ge.s32.totalorder %s646_s24, %s1168_s20  ;;  %p637_p1 = scmp.ge.s32.totalorder %s638_s12, %s1168_s20 }
 0x281   : >> { %s1203_s24 = smov (%p647_p0, %s646_s24), 0  ;;  %640 = sbr.rel (!%p637_p1) target bundleno = 638 (0x27e), region = 149 }
 0x282   : >> { %s782_s30 = sshll.u32 %s1203_s24, 3  ;;  %s1014_s11 = smov %s1203_s24  }
 0x283   : >> { %s651_s29 = scalar_lea.vmem %s632_s22, %s782_s30 [#allocation2]   ;;  %s652_s26 = scalar_lea.vmem %s634_s23, %s782_s30  }
 0x288 PF: > { %p14_p2 = scmp.ge.s32.totalorder %s1078_s28, 5   ;;  %s1195_s24 = smov %s983_s25 }
 0x289   : > { %s1196_s25 = smov %s1086_s8  ;;  %s1197_s26 = smov %s1078_s28 }
 0x28a   :  { %16 = sbr.rel (!%p14_p2) target bundleno = 2 (0x2), region = 160 }

</bundles_post_ra>
